<compile_context>
chip_gen: v7x
topology: tpu7x:2x2x1
jax: 0.10.0
libtpu: 0.0.40
codegen_flags: <defaults>
</compile_context>

<pallas_src>
import math
from functools import partial

import jax
import jax.numpy as jnp
from jax import lax
from jax.experimental import pallas as pl
from jax.experimental.pallas import tpu as pltpu


_INV_SQRT2 = 1.0 / math.sqrt(2.0)


def _gelu_exact(x):
    # torch.nn.functional.gelu default = exact erf form.
    return 0.5 * x * (1.0 + lax.erf(x * _INV_SQRT2))


def _features_cross_kernel(x_ref, ln_g_ref, ln_b_ref, wqkv_ref, bqkv_ref,
                           wo_ref, bo_ref, w1_ref, b1_ref, w2_ref, b2_ref,
                           o_ref, *, scale):
    """One batch element per grid step: full pre-norm Block + cross_norm."""
    S, H = x_ref.shape[1], x_ref.shape[2]
    nh, hd = wqkv_ref.shape[1], wqkv_ref.shape[3]

    x = x_ref[0].astype(jnp.float32)                  # (S, H) residual stream
    ln_g = ln_g_ref[...].astype(jnp.float32)          # (3, 1, H)
    ln_b = ln_b_ref[...].astype(jnp.float32)          # (3, 1, H)

    def layer_norm(v, i):
        mu = jnp.mean(v, axis=-1, keepdims=True)
        var = jnp.mean(jnp.square(v - mu), axis=-1, keepdims=True)
        return (v - mu) * lax.rsqrt(var + 1e-6) * ln_g[i] + ln_b[i]

    # ---------------- Attention (attention_norm -> attn -> +residual) --------
    xn = layer_norm(x, 0)
    xn_h = jnp.broadcast_to(xn, (nh, S, H))           # head-batched view (cheap)

    wqkv = wqkv_ref[...].astype(jnp.float32)          # (3, nh, H, hd)
    bqkv = bqkv_ref[...].astype(jnp.float32)          # (3, nh, 1, hd)
    q = jnp.einsum('hsk,hkd->hsd', xn_h, wqkv[0],
                   preferred_element_type=jnp.float32) + bqkv[0]
    k = jnp.einsum('hsk,hkd->hsd', xn_h, wqkv[1],
                   preferred_element_type=jnp.float32) + bqkv[1]
    v = jnp.einsum('hsk,hkd->hsd', xn_h, wqkv[2],
                   preferred_element_type=jnp.float32) + bqkv[2]

    scores = jnp.einsum('hqd,hkd->hqk', q, k,
                        preferred_element_type=jnp.float32) * scale
    scores = scores - jnp.max(scores, axis=-1, keepdims=True)
    e = jnp.exp(scores)
    probs = e / jnp.sum(e, axis=-1, keepdims=True)
    # attn_dropout: identity (inference)

    ctx = jnp.einsum('hqk,hkd->hqd', probs, v,
                     preferred_element_type=jnp.float32)          # (nh, S, hd)
    per_head = jnp.einsum('hsd,hdo->hso', ctx,
                          wo_ref[...].astype(jnp.float32),
                          preferred_element_type=jnp.float32)     # (nh, S, H)
    attn_out = jnp.sum(per_head, axis=0) + bo_ref[...].astype(jnp.float32)
    # proj_dropout: identity (inference)
    x = x + attn_out

    # ---------------- MLP (ffn_norm -> fc1 -> gelu -> fc2 -> +residual) ------
    xn2 = layer_norm(x, 1)
    h1 = jnp.dot(xn2, w1_ref[...].astype(jnp.float32),
                 preferred_element_type=jnp.float32)
    h1 = h1 + b1_ref[...].astype(jnp.float32)
    h1 = _gelu_exact(h1)
    # dropout: identity (inference)
    h2 = jnp.dot(h1, w2_ref[...].astype(jnp.float32),
                 preferred_element_type=jnp.float32)
    h2 = h2 + b2_ref[...].astype(jnp.float32)
    # dropout: identity (inference)
    x = x + h2

    # ---------------- final cross_norm ----------------
    o_ref[0] = layer_norm(x, 2).astype(o_ref.dtype)


def _full_spec(a):
    n = a.ndim
    return pl.BlockSpec(a.shape, lambda b, n=n: (0,) * n)


@partial(jax.jit, static_argnames=("num_heads",))
def features_cross_forward(x, params, *, num_heads):
    """x: (B, S, H). `params` holds torch-layout weights (out_features, in_features)."""
    B, S, H = x.shape
    nh = num_heads
    hd = H // nh
    D = params["fc1_w"].shape[0]
    scale = 1.0 / math.sqrt(hd)

    # ------- layout plumbing: torch (out, in) -> head-batched kernel layout ----
    def head_split_w(w):      # (nh*hd, H) -> (nh, H, hd)
        return jnp.transpose(w.T.reshape(H, nh, hd), (1, 0, 2))

    def head_split_b(b):      # (nh*hd,) -> (nh, 1, hd)
        return b.reshape(nh, 1, hd)

    wqkv = jnp.stack([head_split_w(params["q_w"]),
                      head_split_w(params["k_w"]),
                      head_split_w(params["v_w"])])               # (3, nh, H, hd)
    bqkv = jnp.stack([head_split_b(params["q_b"]),
                      head_split_b(params["k_b"]),
                      head_split_b(params["v_b"])])               # (3, nh, 1, hd)
    wo = params["out_w"].T.reshape(nh, hd, H)                     # (nh, hd, H)
    bo = params["out_b"].reshape(1, H)
    w1 = params["fc1_w"].T                                        # (H, D)
    b1 = params["fc1_b"].reshape(1, D)
    w2 = params["fc2_w"].T                                        # (D, H)
    b2 = params["fc2_b"].reshape(1, H)
    ln_g = jnp.stack([params["attn_ln_g"], params["ffn_ln_g"],
                      params["cross_ln_g"]]).reshape(3, 1, H)
    ln_b = jnp.stack([params["attn_ln_b"], params["ffn_ln_b"],
                      params["cross_ln_b"]]).reshape(3, 1, H)

    kernel = partial(_features_cross_kernel, scale=scale)

    out = pl.pallas_call(
        kernel,
        out_shape=jax.ShapeDtypeStruct((B, S, H), x.dtype),
        grid_spec=pltpu.PrefetchScalarGridSpec(
            num_scalar_prefetch=0,
            grid=(B,),
            in_specs=[
                pl.BlockSpec((1, S, H), lambda b: (b, 0, 0)),     # x (per batch)
                _full_spec(ln_g), _full_spec(ln_b),
                _full_spec(wqkv), _full_spec(bqkv),
                _full_spec(wo), _full_spec(bo),
                _full_spec(w1), _full_spec(b1),
                _full_spec(w2), _full_spec(b2),
            ],
            out_specs=pl.BlockSpec((1, S, H), lambda b: (b, 0, 0)),
        ),
        compiler_params=pltpu.CompilerParams(
            dimension_semantics=("parallel",),
            # NOTE: at demo size VMEM use is a few KB; for real ViT shapes raise
            # vmem_limit_bytes (v5e/v6e) or switch weights to bf16 / D-split (v7x).
        ),
    )(x, ln_g, ln_b, wqkv, bqkv, wo, bo, w1, b1, w2, b2)
    return out


def _xavier_uniform(key, out_f, in_f, dtype=jnp.float32):
    bound = math.sqrt(6.0 / (in_f + out_f))
    return jax.random.uniform(key, (out_f, in_f), dtype, minval=-bound, maxval=bound)


def _reference(x, p, nh):
    """Pure-JAX mirror of the torch Features_cross forward (eval mode)."""
    B, S, H = x.shape
    hd = H // nh

    def ln(v, g, b):
        mu = v.mean(-1, keepdims=True)
        var = jnp.square(v - mu).mean(-1, keepdims=True)
        return (v - mu) / jnp.sqrt(var + 1e-6) * g + b

    h0 = x
    xn = ln(x, p["attn_ln_g"], p["attn_ln_b"])
    q = xn @ p["q_w"].T + p["q_b"]
    k = xn @ p["k_w"].T + p["k_b"]
    v = xn @ p["v_w"].T + p["v_b"]

    def split(t):
        return t.reshape(B, S, nh, hd).transpose(0, 2, 1, 3)

    q, k, v = split(q), split(k), split(v)
    scores = jnp.matmul(q, k.transpose(0, 1, 3, 2)) / math.sqrt(hd)
    probs = jax.nn.softmax(scores, axis=-1)
    ctx = jnp.matmul(probs, v).transpose(0, 2, 1, 3).reshape(B, S, H)
    attn_out = ctx @ p["out_w"].T + p["out_b"]
    x = attn_out + h0

    h1 = x
    xn = ln(x, p["ffn_ln_g"], p["ffn_ln_b"])
    m = xn @ p["fc1_w"].T + p["fc1_b"]
    m = _gelu_exact(m)
    m = m @ p["fc2_w"].T + p["fc2_b"]
    x = m + h1

    return ln(x, p["cross_ln_g"], p["cross_ln_b"])


if __name__ == "__main__":
    # Small config: hidden_size=32, num_heads=4, mlp_dim=64, batch=2, seq=8.
    B, S, HIDDEN, MLP_DIM, NUM_HEADS = 2, 8, 32, 64, 4

    key = jax.random.PRNGKey(0)
    ks = jax.random.split(key, 20)

    x = jax.random.normal(ks[0], (B, S, HIDDEN), jnp.float32)

    params = {
        # attention projections, torch layout (out_features, in_features)
        "q_w": _xavier_uniform(ks[1], HIDDEN, HIDDEN),
        "k_w": _xavier_uniform(ks[2], HIDDEN, HIDDEN),
        "v_w": _xavier_uniform(ks[3], HIDDEN, HIDDEN),
        "out_w": _xavier_uniform(ks[4], HIDDEN, HIDDEN),
        "q_b": 0.02 * jax.random.normal(ks[5], (HIDDEN,)),
        "k_b": 0.02 * jax.random.normal(ks[6], (HIDDEN,)),
        "v_b": 0.02 * jax.random.normal(ks[7], (HIDDEN,)),
        "out_b": 0.02 * jax.random.normal(ks[8], (HIDDEN,)),
        # MLP, torch layout
        "fc1_w": _xavier_uniform(ks[9], MLP_DIM, HIDDEN),
        "fc2_w": _xavier_uniform(ks[10], HIDDEN, MLP_DIM),
        "fc1_b": 1e-6 * jax.random.normal(ks[11], (MLP_DIM,)),
        "fc2_b": 1e-6 * jax.random.normal(ks[12], (HIDDEN,)),
        # LayerNorms (attention_norm, ffn_norm, cross_norm)
        "attn_ln_g": 1.0 + 0.1 * jax.random.normal(ks[13], (HIDDEN,)),
        "attn_ln_b": 0.1 * jax.random.normal(ks[14], (HIDDEN,)),
        "ffn_ln_g": 1.0 + 0.1 * jax.random.normal(ks[15], (HIDDEN,)),
        "ffn_ln_b": 0.1 * jax.random.normal(ks[16], (HIDDEN,)),
        "cross_ln_g": 1.0 + 0.1 * jax.random.normal(ks[17], (HIDDEN,)),
        "cross_ln_b": 0.1 * jax.random.normal(ks[18], (HIDDEN,)),
    }

    out = features_cross_forward(x, params, num_heads=NUM_HEADS)
    jax.block_until_ready(out)

    ref = _reference(x, params, NUM_HEADS)
    assert out.shape == (B, S, HIDDEN)
    assert jnp.allclose(out, ref, atol=1e-4, rtol=1e-4), (
        float(jnp.max(jnp.abs(out - ref))))

    print("KERNEL_OK")
</pallas_src>

<mosaic_0001>
module attributes {stable_mosaic.version = 11 : i64} {
  func.func @_features_cross_kernel(%arg0: i32, %arg1: memref<1x8x32xf32, #tpu.memory_space<vmem>>, %arg2: memref<3x1x32xf32, #tpu.memory_space<vmem>>, %arg3: memref<3x1x32xf32, #tpu.memory_space<vmem>>, %arg4: memref<3x4x32x8xf32, #tpu.memory_space<vmem>>, %arg5: memref<3x4x1x8xf32, #tpu.memory_space<vmem>>, %arg6: memref<4x8x32xf32, #tpu.memory_space<vmem>>, %arg7: memref<1x32xf32, #tpu.memory_space<vmem>>, %arg8: memref<32x64xf32, #tpu.memory_space<vmem>>, %arg9: memref<1x64xf32, #tpu.memory_space<vmem>>, %arg10: memref<64x32xf32, #tpu.memory_space<vmem>>, %arg11: memref<1x32xf32, #tpu.memory_space<vmem>>, %arg12: memref<1x8x32xf32, #tpu.memory_space<vmem>>) attributes {dimension_semantics = [#tpu.dimension_semantics<parallel>], iteration_bounds = array<i64: 2>, scalar_prefetch = 0 : i64, scratch_operands = 0 : i64, tpu.core_type = #tpu.core_type<tc>, window_params = [{transform_indices = @transform_0, window_bounds = array<i64: 1, 8, 32>}, {pipeline_mode = #tpu.pipeline_mode<synchronous>, transform_indices = @transform_1, window_bounds = array<i64: 3, 1, 32>}, {pipeline_mode = #tpu.pipeline_mode<synchronous>, transform_indices = @transform_2, window_bounds = array<i64: 3, 1, 32>}, {pipeline_mode = #tpu.pipeline_mode<synchronous>, transform_indices = @transform_3, window_bounds = array<i64: 3, 4, 32, 8>}, {pipeline_mode = #tpu.pipeline_mode<synchronous>, transform_indices = @transform_4, window_bounds = array<i64: 3, 4, 1, 8>}, {pipeline_mode = #tpu.pipeline_mode<synchronous>, transform_indices = @transform_5, window_bounds = array<i64: 4, 8, 32>}, {pipeline_mode = #tpu.pipeline_mode<synchronous>, transform_indices = @transform_6, window_bounds = array<i64: 1, 32>}, {pipeline_mode = #tpu.pipeline_mode<synchronous>, transform_indices = @transform_7, window_bounds = array<i64: 32, 64>}, {pipeline_mode = #tpu.pipeline_mode<synchronous>, transform_indices = @transform_8, window_bounds = array<i64: 1, 64>}, {pipeline_mode = #tpu.pipeline_mode<synchronous>, transform_indices = @transform_9, window_bounds = array<i64: 64, 32>}, {pipeline_mode = #tpu.pipeline_mode<synchronous>, transform_indices = @transform_10, window_bounds = array<i64: 1, 32>}, {transform_indices = @transform_11, window_bounds = array<i64: 1, 8, 32>}]} {
    %c0 = arith.constant 0 : index
    %c0_0 = arith.constant 0 : index
    %c0_1 = arith.constant 0 : index
    %0 = vector.load %arg1[%c0, %c0_0, %c0_1] : memref<1x8x32xf32, #tpu.memory_space<vmem>>, vector<1x8x32xf32>
    %1 = vector.shape_cast %0 : vector<1x8x32xf32> to vector<8x32xf32>
    %c0_2 = arith.constant 0 : index
    %c0_3 = arith.constant 0 : index
    %c0_4 = arith.constant 0 : index
    %2 = vector.load %arg2[%c0_2, %c0_3, %c0_4] : memref<3x1x32xf32, #tpu.memory_space<vmem>>, vector<3x1x32xf32>
    %c0_5 = arith.constant 0 : index
    %c0_6 = arith.constant 0 : index
    %c0_7 = arith.constant 0 : index
    %3 = vector.load %arg3[%c0_5, %c0_6, %c0_7] : memref<3x1x32xf32, #tpu.memory_space<vmem>>, vector<3x1x32xf32>
    %cst = arith.constant dense<0.000000e+00> : vector<8xf32>
    %4 = vector.multi_reduction <add>, %1, %cst [1] : vector<8x32xf32> to vector<8xf32>
    %5 = vector.shape_cast %4 : vector<8xf32> to vector<8x1xf32>
    %cst_8 = arith.constant 3.200000e+01 : f32
    %6 = vector.broadcast %cst_8 : f32 to vector<8x1xf32>
    %7 = arith.divf %5, %6 : vector<8x1xf32>
    %8 = vector.broadcast %7 : vector<8x1xf32> to vector<8x32xf32>
    %9 = arith.subf %1, %8 : vector<8x32xf32>
    %10 = arith.mulf %9, %9 : vector<8x32xf32>
    %cst_9 = arith.constant dense<0.000000e+00> : vector<8xf32>
    %11 = vector.multi_reduction <add>, %10, %cst_9 [1] : vector<8x32xf32> to vector<8xf32>
    %12 = vector.shape_cast %11 : vector<8xf32> to vector<8x1xf32>
    %cst_10 = arith.constant 3.200000e+01 : f32
    %13 = vector.broadcast %cst_10 : f32 to vector<8x1xf32>
    %14 = arith.divf %12, %13 : vector<8x1xf32>
    %15 = vector.broadcast %7 : vector<8x1xf32> to vector<8x32xf32>
    %16 = arith.subf %1, %15 : vector<8x32xf32>
    %cst_11 = arith.constant 9.99999997E-7 : f32
    %17 = vector.broadcast %cst_11 : f32 to vector<8x1xf32>
    %18 = arith.addf %14, %17 : vector<8x1xf32>
    %19 = math.rsqrt %18 : vector<8x1xf32>
    %20 = vector.broadcast %19 : vector<8x1xf32> to vector<8x32xf32>
    %21 = arith.mulf %16, %20 : vector<8x32xf32>
    %22 = vector.extract_strided_slice %2 {offsets = [0, 0, 0], sizes = [1, 1, 32], strides = [1, 1, 1]} : vector<3x1x32xf32> to vector<1x1x32xf32>
    %23 = vector.shape_cast %22 : vector<1x1x32xf32> to vector<1x32xf32>
    %24 = vector.broadcast %23 : vector<1x32xf32> to vector<8x32xf32>
    %25 = arith.mulf %21, %24 : vector<8x32xf32>
    %26 = vector.extract_strided_slice %3 {offsets = [0, 0, 0], sizes = [1, 1, 32], strides = [1, 1, 1]} : vector<3x1x32xf32> to vector<1x1x32xf32>
    %27 = vector.shape_cast %26 : vector<1x1x32xf32> to vector<1x32xf32>
    %28 = vector.broadcast %27 : vector<1x32xf32> to vector<8x32xf32>
    %29 = arith.addf %25, %28 : vector<8x32xf32>
    %30 = vector.shape_cast %29 : vector<8x32xf32> to vector<1x8x32xf32>
    %31 = vector.broadcast %30 : vector<1x8x32xf32> to vector<4x8x32xf32>
    %c0_12 = arith.constant 0 : index
    %c0_13 = arith.constant 0 : index
    %c0_14 = arith.constant 0 : index
    %c0_15 = arith.constant 0 : index
    %32 = vector.load %arg4[%c0_12, %c0_13, %c0_14, %c0_15] : memref<3x4x32x8xf32, #tpu.memory_space<vmem>>, vector<3x4x32x8xf32>
    %c0_16 = arith.constant 0 : index
    %c0_17 = arith.constant 0 : index
    %c0_18 = arith.constant 0 : index
    %c0_19 = arith.constant 0 : index
    %33 = vector.load %arg5[%c0_16, %c0_17, %c0_18, %c0_19] : memref<3x4x1x8xf32, #tpu.memory_space<vmem>>, vector<3x4x1x8xf32>
    %34 = vector.extract_strided_slice %32 {offsets = [0, 0, 0, 0], sizes = [1, 4, 32, 8], strides = [1, 1, 1, 1]} : vector<3x4x32x8xf32> to vector<1x4x32x8xf32>
    %35 = vector.shape_cast %34 : vector<1x4x32x8xf32> to vector<4x32x8xf32>
    "tpu.trace_start"() <{level = 10 : i32, message = "hsk,hkd->hsd"}> : () -> ()
    %cst_20 = arith.constant dense<0.000000e+00> : vector<4x8x8xf32>
    %36 = tpu.matmul %31, %35, %cst_20 {dimension_numbers = #tpu.dot_dimension_numbers<[2], [1], [1], [2], [0, 0, 0, 1, 1, 2], [0], [0]>} : vector<4x8x32xf32>, vector<4x32x8xf32>, vector<4x8x8xf32> -> vector<4x8x8xf32>
    "tpu.trace_stop"() : () -> ()
    %37 = vector.extract_strided_slice %33 {offsets = [0, 0, 0, 0], sizes = [1, 4, 1, 8], strides = [1, 1, 1, 1]} : vector<3x4x1x8xf32> to vector<1x4x1x8xf32>
    %38 = vector.shape_cast %37 : vector<1x4x1x8xf32> to vector<4x1x8xf32>
    %39 = vector.broadcast %38 : vector<4x1x8xf32> to vector<4x8x8xf32>
    %40 = arith.addf %36, %39 : vector<4x8x8xf32>
    %41 = vector.extract_strided_slice %32 {offsets = [1, 0, 0, 0], sizes = [1, 4, 32, 8], strides = [1, 1, 1, 1]} : vector<3x4x32x8xf32> to vector<1x4x32x8xf32>
    %42 = vector.shape_cast %41 : vector<1x4x32x8xf32> to vector<4x32x8xf32>
    "tpu.trace_start"() <{level = 10 : i32, message = "hsk,hkd->hsd"}> : () -> ()
    %cst_21 = arith.constant dense<0.000000e+00> : vector<4x8x8xf32>
    %43 = tpu.matmul %31, %42, %cst_21 {dimension_numbers = #tpu.dot_dimension_numbers<[2], [1], [1], [2], [0, 0, 0, 1, 1, 2], [0], [0]>} : vector<4x8x32xf32>, vector<4x32x8xf32>, vector<4x8x8xf32> -> vector<4x8x8xf32>
    "tpu.trace_stop"() : () -> ()
    %44 = vector.extract_strided_slice %33 {offsets = [1, 0, 0, 0], sizes = [1, 4, 1, 8], strides = [1, 1, 1, 1]} : vector<3x4x1x8xf32> to vector<1x4x1x8xf32>
    %45 = vector.shape_cast %44 : vector<1x4x1x8xf32> to vector<4x1x8xf32>
    %46 = vector.broadcast %45 : vector<4x1x8xf32> to vector<4x8x8xf32>
    %47 = arith.addf %43, %46 : vector<4x8x8xf32>
    %48 = vector.extract_strided_slice %32 {offsets = [2, 0, 0, 0], sizes = [1, 4, 32, 8], strides = [1, 1, 1, 1]} : vector<3x4x32x8xf32> to vector<1x4x32x8xf32>
    %49 = vector.shape_cast %48 : vector<1x4x32x8xf32> to vector<4x32x8xf32>
    "tpu.trace_start"() <{level = 10 : i32, message = "hsk,hkd->hsd"}> : () -> ()
    %cst_22 = arith.constant dense<0.000000e+00> : vector<4x8x8xf32>
    %50 = tpu.matmul %31, %49, %cst_22 {dimension_numbers = #tpu.dot_dimension_numbers<[2], [1], [1], [2], [0, 0, 0, 1, 1, 2], [0], [0]>} : vector<4x8x32xf32>, vector<4x32x8xf32>, vector<4x8x8xf32> -> vector<4x8x8xf32>
    "tpu.trace_stop"() : () -> ()
    %51 = vector.extract_strided_slice %33 {offsets = [2, 0, 0, 0], sizes = [1, 4, 1, 8], strides = [1, 1, 1, 1]} : vector<3x4x1x8xf32> to vector<1x4x1x8xf32>
    %52 = vector.shape_cast %51 : vector<1x4x1x8xf32> to vector<4x1x8xf32>
    %53 = vector.broadcast %52 : vector<4x1x8xf32> to vector<4x8x8xf32>
    %54 = arith.addf %50, %53 : vector<4x8x8xf32>
    "tpu.trace_start"() <{level = 10 : i32, message = "hqd,hkd->hqk"}> : () -> ()
    %cst_23 = arith.constant dense<0.000000e+00> : vector<4x8x8xf32>
    %55 = tpu.matmul %40, %47, %cst_23 {dimension_numbers = #tpu.dot_dimension_numbers<[2], [2], [1], [1], [0, 0, 0, 1, 1, 1], [0], [0]>} : vector<4x8x8xf32>, vector<4x8x8xf32>, vector<4x8x8xf32> -> vector<4x8x8xf32>
    "tpu.trace_stop"() : () -> ()
    %cst_24 = arith.constant 0.353553385 : f32
    %56 = vector.broadcast %cst_24 : f32 to vector<4x8x8xf32>
    %57 = arith.mulf %55, %56 : vector<4x8x8xf32>
    %cst_25 = arith.constant dense<0xFF800000> : vector<4x8xf32>
    %58 = vector.multi_reduction <maximumf>, %57, %cst_25 [2] : vector<4x8x8xf32> to vector<4x8xf32>
    %59 = vector.shape_cast %58 : vector<4x8xf32> to vector<4x8x1xf32>
    %60 = vector.broadcast %59 : vector<4x8x1xf32> to vector<4x8x8xf32>
    %61 = arith.subf %57, %60 : vector<4x8x8xf32>
    %62 = math.exp %61 : vector<4x8x8xf32>
    %cst_26 = arith.constant dense<0.000000e+00> : vector<4x8xf32>
    %63 = vector.multi_reduction <add>, %62, %cst_26 [2] : vector<4x8x8xf32> to vector<4x8xf32>
    %64 = vector.shape_cast %63 : vector<4x8xf32> to vector<4x8x1xf32>
    %65 = vector.broadcast %64 : vector<4x8x1xf32> to vector<4x8x8xf32>
    %66 = arith.divf %62, %65 : vector<4x8x8xf32>
    "tpu.trace_start"() <{level = 10 : i32, message = "hqk,hkd->hqd"}> : () -> ()
    %cst_27 = arith.constant dense<0.000000e+00> : vector<4x8x8xf32>
    %67 = tpu.matmul %66, %54, %cst_27 {dimension_numbers = #tpu.dot_dimension_numbers<[2], [1], [1], [2], [0, 0, 0, 1, 1, 2], [0], [0]>} : vector<4x8x8xf32>, vector<4x8x8xf32>, vector<4x8x8xf32> -> vector<4x8x8xf32>
    "tpu.trace_stop"() : () -> ()
    %c0_28 = arith.constant 0 : index
    %c0_29 = arith.constant 0 : index
    %c0_30 = arith.constant 0 : index
    %68 = vector.load %arg6[%c0_28, %c0_29, %c0_30] : memref<4x8x32xf32, #tpu.memory_space<vmem>>, vector<4x8x32xf32>
    "tpu.trace_start"() <{level = 10 : i32, message = "hsd,hdo->hso"}> : () -> ()
    %cst_31 = arith.constant dense<0.000000e+00> : vector<4x8x32xf32>
    %69 = tpu.matmul %67, %68, %cst_31 {dimension_numbers = #tpu.dot_dimension_numbers<[2], [1], [1], [2], [0, 0, 0, 1, 1, 2], [0], [0]>} : vector<4x8x8xf32>, vector<4x8x32xf32>, vector<4x8x32xf32> -> vector<4x8x32xf32>
    "tpu.trace_stop"() : () -> ()
    %cst_32 = arith.constant dense<0.000000e+00> : vector<8x32xf32>
    %70 = vector.multi_reduction <add>, %69, %cst_32 [0] : vector<4x8x32xf32> to vector<8x32xf32>
    %c0_33 = arith.constant 0 : index
    %c0_34 = arith.constant 0 : index
    %71 = vector.load %arg7[%c0_33, %c0_34] : memref<1x32xf32, #tpu.memory_space<vmem>>, vector<1x32xf32>
    %72 = vector.broadcast %71 : vector<1x32xf32> to vector<8x32xf32>
    %73 = arith.addf %70, %72 : vector<8x32xf32>
    %74 = arith.addf %1, %73 : vector<8x32xf32>
    %cst_35 = arith.constant dense<0.000000e+00> : vector<8xf32>
    %75 = vector.multi_reduction <add>, %74, %cst_35 [1] : vector<8x32xf32> to vector<8xf32>
    %76 = vector.shape_cast %75 : vector<8xf32> to vector<8x1xf32>
    %cst_36 = arith.constant 3.200000e+01 : f32
    %77 = vector.broadcast %cst_36 : f32 to vector<8x1xf32>
    %78 = arith.divf %76, %77 : vector<8x1xf32>
    %79 = vector.broadcast %78 : vector<8x1xf32> to vector<8x32xf32>
    %80 = arith.subf %74, %79 : vector<8x32xf32>
    %81 = arith.mulf %80, %80 : vector<8x32xf32>
    %cst_37 = arith.constant dense<0.000000e+00> : vector<8xf32>
    %82 = vector.multi_reduction <add>, %81, %cst_37 [1] : vector<8x32xf32> to vector<8xf32>
    %83 = vector.shape_cast %82 : vector<8xf32> to vector<8x1xf32>
    %cst_38 = arith.constant 3.200000e+01 : f32
    %84 = vector.broadcast %cst_38 : f32 to vector<8x1xf32>
    %85 = arith.divf %83, %84 : vector<8x1xf32>
    %86 = vector.broadcast %78 : vector<8x1xf32> to vector<8x32xf32>
    %87 = arith.subf %74, %86 : vector<8x32xf32>
    %cst_39 = arith.constant 9.99999997E-7 : f32
    %88 = vector.broadcast %cst_39 : f32 to vector<8x1xf32>
    %89 = arith.addf %85, %88 : vector<8x1xf32>
    %90 = math.rsqrt %89 : vector<8x1xf32>
    %91 = vector.broadcast %90 : vector<8x1xf32> to vector<8x32xf32>
    %92 = arith.mulf %87, %91 : vector<8x32xf32>
    %93 = vector.extract_strided_slice %2 {offsets = [1, 0, 0], sizes = [1, 1, 32], strides = [1, 1, 1]} : vector<3x1x32xf32> to vector<1x1x32xf32>
    %94 = vector.shape_cast %93 : vector<1x1x32xf32> to vector<1x32xf32>
    %95 = vector.broadcast %94 : vector<1x32xf32> to vector<8x32xf32>
    %96 = arith.mulf %92, %95 : vector<8x32xf32>
    %97 = vector.extract_strided_slice %3 {offsets = [1, 0, 0], sizes = [1, 1, 32], strides = [1, 1, 1]} : vector<3x1x32xf32> to vector<1x1x32xf32>
    %98 = vector.shape_cast %97 : vector<1x1x32xf32> to vector<1x32xf32>
    %99 = vector.broadcast %98 : vector<1x32xf32> to vector<8x32xf32>
    %100 = arith.addf %96, %99 : vector<8x32xf32>
    %c0_40 = arith.constant 0 : index
    %c0_41 = arith.constant 0 : index
    %101 = vector.load %arg8[%c0_40, %c0_41] : memref<32x64xf32, #tpu.memory_space<vmem>>, vector<32x64xf32>
    %cst_42 = arith.constant dense<0.000000e+00> : vector<8x64xf32>
    %102 = tpu.matmul %100, %101, %cst_42 {dimension_numbers = #tpu.dot_dimension_numbers<[1], [0], [0], [1], [0, 0, 1, 1], [], []>} : vector<8x32xf32>, vector<32x64xf32>, vector<8x64xf32> -> vector<8x64xf32>
    %c0_43 = arith.constant 0 : index
    %c0_44 = arith.constant 0 : index
    %103 = vector.load %arg9[%c0_43, %c0_44] : memref<1x64xf32, #tpu.memory_space<vmem>>, vector<1x64xf32>
    %104 = vector.broadcast %103 : vector<1x64xf32> to vector<8x64xf32>
    %105 = arith.addf %102, %104 : vector<8x64xf32>
    %cst_45 = arith.constant 5.000000e-01 : f32
    %106 = vector.broadcast %cst_45 : f32 to vector<8x64xf32>
    %107 = arith.mulf %106, %105 : vector<8x64xf32>
    %cst_46 = arith.constant 0.707106769 : f32
    %108 = vector.broadcast %cst_46 : f32 to vector<8x64xf32>
    %109 = arith.mulf %105, %108 : vector<8x64xf32>
    %110 = math.erf %109 : vector<8x64xf32>
    %cst_47 = arith.constant 1.000000e+00 : f32
    %111 = vector.broadcast %cst_47 : f32 to vector<8x64xf32>
    %112 = arith.addf %111, %110 : vector<8x64xf32>
    %113 = arith.mulf %107, %112 : vector<8x64xf32>
    %c0_48 = arith.constant 0 : index
    %c0_49 = arith.constant 0 : index
    %114 = vector.load %arg10[%c0_48, %c0_49] : memref<64x32xf32, #tpu.memory_space<vmem>>, vector<64x32xf32>
    %cst_50 = arith.constant dense<0.000000e+00> : vector<8x32xf32>
    %115 = tpu.matmul %113, %114, %cst_50 {dimension_numbers = #tpu.dot_dimension_numbers<[1], [0], [0], [1], [0, 0, 1, 1], [], []>} : vector<8x64xf32>, vector<64x32xf32>, vector<8x32xf32> -> vector<8x32xf32>
    %c0_51 = arith.constant 0 : index
    %c0_52 = arith.constant 0 : index
    %116 = vector.load %arg11[%c0_51, %c0_52] : memref<1x32xf32, #tpu.memory_space<vmem>>, vector<1x32xf32>
    %117 = vector.broadcast %116 : vector<1x32xf32> to vector<8x32xf32>
    %118 = arith.addf %115, %117 : vector<8x32xf32>
    %119 = arith.addf %74, %118 : vector<8x32xf32>
    %cst_53 = arith.constant dense<0.000000e+00> : vector<8xf32>
    %120 = vector.multi_reduction <add>, %119, %cst_53 [1] : vector<8x32xf32> to vector<8xf32>
    %121 = vector.shape_cast %120 : vector<8xf32> to vector<8x1xf32>
    %cst_54 = arith.constant 3.200000e+01 : f32
    %122 = vector.broadcast %cst_54 : f32 to vector<8x1xf32>
    %123 = arith.divf %121, %122 : vector<8x1xf32>
    %124 = vector.broadcast %123 : vector<8x1xf32> to vector<8x32xf32>
    %125 = arith.subf %119, %124 : vector<8x32xf32>
    %126 = arith.mulf %125, %125 : vector<8x32xf32>
    %cst_55 = arith.constant dense<0.000000e+00> : vector<8xf32>
    %127 = vector.multi_reduction <add>, %126, %cst_55 [1] : vector<8x32xf32> to vector<8xf32>
    %128 = vector.shape_cast %127 : vector<8xf32> to vector<8x1xf32>
    %cst_56 = arith.constant 3.200000e+01 : f32
    %129 = vector.broadcast %cst_56 : f32 to vector<8x1xf32>
    %130 = arith.divf %128, %129 : vector<8x1xf32>
    %131 = vector.broadcast %123 : vector<8x1xf32> to vector<8x32xf32>
    %132 = arith.subf %119, %131 : vector<8x32xf32>
    %cst_57 = arith.constant 9.99999997E-7 : f32
    %133 = vector.broadcast %cst_57 : f32 to vector<8x1xf32>
    %134 = arith.addf %130, %133 : vector<8x1xf32>
    %135 = math.rsqrt %134 : vector<8x1xf32>
    %136 = vector.broadcast %135 : vector<8x1xf32> to vector<8x32xf32>
    %137 = arith.mulf %132, %136 : vector<8x32xf32>
    %138 = vector.extract_strided_slice %2 {offsets = [2, 0, 0], sizes = [1, 1, 32], strides = [1, 1, 1]} : vector<3x1x32xf32> to vector<1x1x32xf32>
    %139 = vector.shape_cast %138 : vector<1x1x32xf32> to vector<1x32xf32>
    %140 = vector.broadcast %139 : vector<1x32xf32> to vector<8x32xf32>
    %141 = arith.mulf %137, %140 : vector<8x32xf32>
    %142 = vector.extract_strided_slice %3 {offsets = [2, 0, 0], sizes = [1, 1, 32], strides = [1, 1, 1]} : vector<3x1x32xf32> to vector<1x1x32xf32>
    %143 = vector.shape_cast %142 : vector<1x1x32xf32> to vector<1x32xf32>
    %144 = vector.broadcast %143 : vector<1x32xf32> to vector<8x32xf32>
    %145 = arith.addf %141, %144 : vector<8x32xf32>
    %c0_58 = arith.constant 0 : index
    %c0_59 = arith.constant 0 : index
    %c0_60 = arith.constant 0 : index
    %146 = vector.load %arg12[%c0_58, %c0_59, %c0_60] : memref<1x8x32xf32, #tpu.memory_space<vmem>>, vector<1x8x32xf32>
    %147 = vector.shape_cast %146 : vector<1x8x32xf32> to vector<8x32xf32>
    %148 = vector.shape_cast %145 : vector<8x32xf32> to vector<1x8x32xf32>
    tpu.vector_store %arg12[%c0_58, %c0_59, %c0_60], %148 {strides = array<i32>} : memref<1x8x32xf32, #tpu.memory_space<vmem>>, vector<1x8x32xf32>,
    return
  }
  func.func @transform_0(%arg0: i32) -> (i32, i32, i32) {
    %c0_i32 = arith.constant 0 : i32
    %c0_i32_0 = arith.constant 0 : i32
    %c0_i32_1 = arith.constant 0 : i32
    return %arg0, %c0_i32, %c0_i32_0 : i32, i32, i32
  }
  func.func @transform_1(%arg0: i32) -> (i32, i32, i32) {
    %c0_i32 = arith.constant 0 : i32
    %c0_i32_0 = arith.constant 0 : i32
    %c0_i32_1 = arith.constant 0 : i32
    %c0_i32_2 = arith.constant 0 : i32
    return %c0_i32, %c0_i32_0, %c0_i32_1 : i32, i32, i32
  }
  func.func @transform_2(%arg0: i32) -> (i32, i32, i32) {
    %c0_i32 = arith.constant 0 : i32
    %c0_i32_0 = arith.constant 0 : i32
    %c0_i32_1 = arith.constant 0 : i32
    %c0_i32_2 = arith.constant 0 : i32
    return %c0_i32, %c0_i32_0, %c0_i32_1 : i32, i32, i32
  }
  func.func @transform_3(%arg0: i32) -> (i32, i32, i32, i32) {
    %c0_i32 = arith.constant 0 : i32
    %c0_i32_0 = arith.constant 0 : i32
    %c0_i32_1 = arith.constant 0 : i32
    %c0_i32_2 = arith.constant 0 : i32
    %c0_i32_3 = arith.constant 0 : i32
    return %c0_i32, %c0_i32_0, %c0_i32_1, %c0_i32_2 : i32, i32, i32, i32
  }
  func.func @transform_4(%arg0: i32) -> (i32, i32, i32, i32) {
    %c0_i32 = arith.constant 0 : i32
    %c0_i32_0 = arith.constant 0 : i32
    %c0_i32_1 = arith.constant 0 : i32
    %c0_i32_2 = arith.constant 0 : i32
    %c0_i32_3 = arith.constant 0 : i32
    return %c0_i32, %c0_i32_0, %c0_i32_1, %c0_i32_2 : i32, i32, i32, i32
  }
  func.func @transform_5(%arg0: i32) -> (i32, i32, i32) {
    %c0_i32 = arith.constant 0 : i32
    %c0_i32_0 = arith.constant 0 : i32
    %c0_i32_1 = arith.constant 0 : i32
    %c0_i32_2 = arith.constant 0 : i32
    return %c0_i32, %c0_i32_0, %c0_i32_1 : i32, i32, i32
  }
  func.func @transform_6(%arg0: i32) -> (i32, i32) {
    %c0_i32 = arith.constant 0 : i32
    %c0_i32_0 = arith.constant 0 : i32
    %c0_i32_1 = arith.constant 0 : i32
    return %c0_i32, %c0_i32_0 : i32, i32
  }
  func.func @transform_7(%arg0: i32) -> (i32, i32) {
    %c0_i32 = arith.constant 0 : i32
    %c0_i32_0 = arith.constant 0 : i32
    %c0_i32_1 = arith.constant 0 : i32
    return %c0_i32, %c0_i32_0 : i32, i32
  }
  func.func @transform_8(%arg0: i32) -> (i32, i32) {
    %c0_i32 = arith.constant 0 : i32
    %c0_i32_0 = arith.constant 0 : i32
    %c0_i32_1 = arith.constant 0 : i32
    return %c0_i32, %c0_i32_0 : i32, i32
  }
  func.func @transform_9(%arg0: i32) -> (i32, i32) {
    %c0_i32 = arith.constant 0 : i32
    %c0_i32_0 = arith.constant 0 : i32
    %c0_i32_1 = arith.constant 0 : i32
    return %c0_i32, %c0_i32_0 : i32, i32
  }
  func.func @transform_10(%arg0: i32) -> (i32, i32) {
    %c0_i32 = arith.constant 0 : i32
    %c0_i32_0 = arith.constant 0 : i32
    %c0_i32_1 = arith.constant 0 : i32
    return %c0_i32, %c0_i32_0 : i32, i32
  }
  func.func @transform_11(%arg0: i32) -> (i32, i32, i32) {
    %c0_i32 = arith.constant 0 : i32
    %c0_i32_0 = arith.constant 0 : i32
    %c0_i32_1 = arith.constant 0 : i32
    return %arg0, %c0_i32, %c0_i32_0 : i32, i32, i32
  }
}

</mosaic_0001>

<bundles_post_ra>
// kernel: features_cross_forward.1
= control target key start
LH: loop header
LB: loop body
LE: loop exit
PB: predicated region body
PF: predicated region fallthrough
CT: control target
= control target key end

     0   :  { %s3849_s0 = inlined_call_operand.vmem [shape: f32[2,8,32], index: 0, kind: input, shape index: {}]   ;;  %s3850_s1 = inlined_call_operand.vmem [shape: f32[3,1,32], index: 1, kind: input, shape index: {}]   ;;  %s3851_s2 = inlined_call_operand.vmem [shape: f32[3,1,32], index: 2, kind: input, shape index: {}]   ;;  %s3852_s3 = inlined_call_operand.vmem [shape: f32[3,4,32,8], index: 3, kind: input, shape index: {}]   ;;  %s3853_s4 = inlined_call_operand.vmem [shape: f32[3,4,1,8], index: 4, kind: input, shape index: {}]   ;;  %s3854_s5 = inlined_call_operand.vmem [shape: f32[4,8,32], index: 5, kind: input, shape index: {}]   ;;  %s3855_s6 = inlined_call_operand.vmem [shape: f32[1,32], index: 6, kind: input, shape index: {}]   ;;  %s3856_s7 = inlined_call_operand.vmem [shape: f32[32,64], index: 7, kind: input, shape index: {}]   ;;  %s3857_s8 = inlined_call_operand.vmem [shape: f32[1,64], index: 8, kind: input, shape index: {}]   ;;  %s3858_s9 = inlined_call_operand.vmem [shape: f32[64,32], index: 9, kind: input, shape index: {}]   ;;  %s3859_s10 = inlined_call_operand.vmem [shape: f32[1,32], index: 10, kind: input, shape index: {}]   ;;  %s3860_s11 = inlined_call_operand.hbm [shape: f32[2,8,32], index: 11, kind: output, shape index: {}]  }
   0x1   :  { %3861 = sst [smem:[#allocation5_spill]] %s3849_s0 }
   0x2   :  { %3862 = sst [smem:[#allocation6_spill]] %s3852_s3 }
   0x3   :  { %16 = vsyncpa [#allocation3], 0 }
   0x4   :  { %18 = vsyncpa [#allocation3 + $0x1], 0  ;;  %s3322_s17 = smov 0   ;;  %s3324_s18 = smov 0  }
   0x5   :  { %s3326_s19 = smov 0   ;;  %s3328_s20 = smov 0  }
   0x6 LB: > { %s3343_s21 = sadd.s32 4294967295, %s3256_s20   ;;  %s2657_s22 = sadd.s32 4294967294, %s3256_s20   ;;  %s3256_s20 = sphi %s3328_s20, %s3870_s20   ;;  %s3252_s19 = sphi %s3326_s19, %s3869_s19   ;;  %s3248_s18 = sphi %s3324_s18, %s3868_s18   ;;  %s3244_s17 = sphi %s3322_s17, %s3867_s17  }
   0x7   : > { %s3347_s23 = sadd.s32 1, %s3256_s20   ;;  %s267_s24 = sadd.s32 1, %s3252_s19 }
   0x8   : > { %s264_s25 = ssub.s32 %s3256_s20, %s3347_s23  ;;  %p277_p0 = scmp.ne.s32.totalorder %s3252_s19, %s3248_s18 }
   0x9   : > { %p265_p1 = scmp.eq.s32.totalorder %s264_s25, 0  ;;  %p278_p2 = scmp.eq.s32.totalorder %s3343_s21, 1 }
   0xa   : > { %p283_p3 = scmp.ne.s32.totalorder %s3248_s18, %s3244_s17  ;;  %p284_p4 = scmp.eq.s32.totalorder %s2657_s22, 1 }
   0xb   : > { %s3358_s26 = scalar_select %p265_p1, %s3252_s19, %s267_s24  }
   0xc   : > { %p3360_p5 = por %p278_p2, %p277_p0  ;;  %p3364_p6 = por %p284_p4, %p283_p3 }
   0xd   : > { %p2660_p7 = scmp.ge.s32.totalorder %s3256_s20, 1  ;;  %p339_p8 = scmp.lt.s32.totalorder %s3256_s20, 3 }
   0xf   : > { %p340_p9 = pnand %p2660_p7, %p339_p8 }
  0x10   : > { %p378_p10 = scmp.lt.s32.totalorder (!%p340_p9), %s3343_s21, 1  ;;  %vm389_vm0 = vcmask (!%p340_p9), 261120   ;;  %s3865_s0 = sld [smem:[#allocation5_spill]] (!%p340_p9)  ;;  %v3258_v12 = vmov (!%p340_p9), 0.0|0.0   ;;  %vm3259_vm1 = vmmov (!%p340_p9), 0   ;;  %v3260_v20 = vmov (!%p340_p9), 0.0  }
  0x11   : > { %343 = sbr.rel (%p340_p9) target bundleno = 2632 (0xa48), region = 64  ;;  %s3866_s3 = sld [smem:[#allocation6_spill]] (!%p340_p9)  ;;  %3038 = vmatprep.subr.bf16.mxu0 (!%p340_p9), %v3258_v12  ;;  %3044 = vmatprep.subr.bf16.mxu1 (!%p340_p9), %v3258_v12  ;;  %v2663_v25 = vld [vmem:[%s3850_s1] ss:$0 sm:$0xff] (!%p340_p9)  ;;  %vm1393_vm2 = vcmask (!%p340_p9), 64512   ;;  %vm2481_vm3 = vcmask (!%p340_p9), 523264  }
  0x12   : > { %2824 = vmatprep.mubr.msk.f32.mxu0 (!%p340_p9), %vm3259_vm1, %v3260_v20  ;;  %2835 = vmatprep.mubr.msk.f32.mxu1 (!%p340_p9), %vm3259_vm1, %v3260_v20  ;;  %v2664_v31 = vld [vmem:[%s3851_s2] ss:$0 sm:$0xff] (!%p340_p9)  ;;  %s375_s24 = sand.u32 (!%p340_p9), 1, %s3248_s18   ;;  %s2715_s13 = sshll.u32 (!%p340_p9), %s3343_s21, 7 }
  0x13   : > { %s2585_s25 = scalar_lea.sflag (!%p340_p9), [#allocation3], %s375_s24 }
  0x17   : > { %v418_v7 = vld [vmem:[%s3866_s3] sm:$0xff] (!%p340_p9)  ;;  %v419_v8 = vld [vmem:[%s3866_s3 + $0x8] sm:$0xff] (!%p340_p9)  ;;  %v420_v14 = vld [vmem:[%s3866_s3 + $0x10] sm:$0xff] (!%p340_p9) }
  0x18   : > { %s379_s29 = scalar_select %p378_p10, %s3343_s21, 1  ;;  %v422_v9 = vld [vmem:[%s3866_s3 + $0x20] sm:$0xff]  ;;  %v3039_v10 = vpack.c.bf16 %v419_v8, %v418_v7  ;;  %v423_v11 = vld [vmem:[%s3866_s3 + $0x28] sm:$0xff]  ;;  %v421_v15 = vld [vmem:[%s3866_s3 + $0x18] sm:$0xff] }
  0x19   : > { %v3045_v13 = vpack.c.bf16 %v423_v11, %v422_v9  ;;  %v424_v16 = vld [vmem:[%s3866_s3 + $0x30] sm:$0xff]  ;;  %v3042_v17 = vpack.c.bf16 %v421_v15, %v420_v14  ;;  %v425_v18 = vld [vmem:[%s3866_s3 + $0x38] sm:$0xff]  ;;  %v426_v26 = vld [vmem:[%s3866_s3 + $0x40] sm:$0xff]  ;;  %s3261_s21 = smov [#allocation2]  }
  0x1a   : > { %s2662_s30 = sshll.u32 %s379_s29, 3  ;;  %3040 = vmatpush3.bf16.msra.mxu0 %v3039_v10  ;;  %v3048_v19 = vpack.c.bf16 %v425_v18, %v424_v16  ;;  %v427_v28 = vld [vmem:[%s3866_s3 + $0x48] sm:$0xff]  ;;  %v430_v29 = vld [vmem:[%s3866_s3 + $0x60] sm:$0xff]  ;;  %v428_v35 = vld [vmem:[%s3866_s3 + $0x50] sm:$0xff] }
  0x1b   : > { %s381_s14 = scalar_lea.vmem %s3865_s0, %s2662_s30  ;;  %3046 = vmatpush3.bf16.msra.mxu1 %v3045_v13  ;;  %3041 = vmatprep.subr.bf16.mxu0 %v3258_v12  ;;  %v431_v30 = vld [vmem:[%s3866_s3 + $0x68] sm:$0xff]  ;;  %v3051_v33 = vpack.c.bf16 %v427_v28, %v426_v26  ;;  %v429_v37 = vld [vmem:[%s3866_s3 + $0x58] sm:$0xff]  ;;  %v432_v38 = vld [vmem:[%s3866_s3 + $0x70] sm:$0xff]  ;;  %s2661_s0 = sshll.u32 %s375_s24, 3 }
  0x1c   : > { %v3375_v0 = vld [vmem:[%s381_s14] sm:$0xff]  ;;  %3047 = vmatprep.subr.bf16.mxu1 %v3258_v12  ;;  %v3057_v34 = vpack.c.bf16 %v431_v30, %v430_v29  ;;  %v433_v39 = vld [vmem:[%s3866_s3 + $0x78] sm:$0xff]  ;;  %v3054_v40 = vpack.c.bf16 %v429_v37, %v428_v35  ;;  %v435_v43 = vld [vmem:[%s3866_s3 + $0x88] sm:$0xff]  ;;  %s377_s14 = scalar_lea.vmem [#allocation2], %s2661_s0  ;;  %s3198_s0 = sshll.u32 %s3261_s21, 4  ;;  %s3199_s0 = int_to_ptr.vmem [resolvable:$false] %s3198_s0 }
  0x1d   : > { %v390_v1 = vsel %vm389_vm0, %v3375_v0, 0.0  ;;  %v3060_v41 = vpack.c.bf16 %v433_v39, %v432_v38  ;;  %v434_v42 = vld [vmem:[%s3866_s3 + $0x80] sm:$0xff]  ;;  %v439_v45 = vld [vmem:[%s3866_s3 + $0xa8] sm:$0xff]  ;;  %v436_v48 = vld [vmem:[%s3866_s3 + $0x90] sm:$0xff]  ;;  %s2598_s15 = sshll.u32 %s377_s14, 4  ;;  %s3200_s30 = scalar_lea.vmem %s3199_s0, 256  ;;  %s3808_s15 = int_to_ptr.vmem [resolvable:$true] %s2598_s15 }
  0x1e   : > { %391 = vadd.xlane.f32.xlu0 %v390_v1  ;;  %3043 = vmatpush3.bf16.msra.mxu0 %v3042_v17  ;;  %v438_v44 = vld [vmem:[%s3866_s3 + $0xa0] sm:$0xff]  ;;  %v3063_v46 = vpack.c.bf16 %v435_v43, %v434_v42  ;;  %v437_v49 = vld [vmem:[%s3866_s3 + $0x98] sm:$0xff]  ;;  %v440_v50 = vld [vmem:[%s3866_s3 + $0xb0] sm:$0xff]  ;;  %s3194_s29 = scalar_lea.vmem %s3808_s15, 128  ;;  %p3201_p0 = scmp.lt.s32.totalorder %s3808_s15, %s3199_s0 }
  0x1f   : > { %3049 = vmatpush3.bf16.msra.mxu1 %v3048_v19  ;;  %3050 = vmatprep.subr.bf16.mxu0 %v3258_v12  ;;  %v3069_v47 = vpack.c.bf16 %v439_v45, %v438_v44  ;;  %v441_v51 = vld [vmem:[%s3866_s3 + $0xb8] sm:$0xff]  ;;  %v3066_v52 = vpack.c.bf16 %v437_v49, %v436_v48  ;;  %v442_v54 = vld [vmem:[%s3866_s3 + $0xc0] sm:$0xff]  ;;  %v443_v55 = vld [vmem:[%s3866_s3 + $0xc8] sm:$0xff]  ;;  %p3195_p11 = scmp.ne.s32.totalorder %s3808_s15, %s3194_s29  ;;  %p3202_p1 = scmp.lt.s32.totalorder %s3200_s30, %s3194_s29 }
  0x20   : > { %3056 = vmatprep.subr.bf16.mxu1 %v3258_v12  ;;  %v3072_v53 = vpack.c.bf16 %v441_v51, %v440_v50  ;;  %v446_v56 = vld [vmem:[%s3866_s3 + $0xe0] sm:$0xff]  ;;  %v447_v57 = vld [vmem:[%s3866_s3 + $0xe8] sm:$0xff]  ;;  %v3075_v58 = vpack.c.bf16 %v443_v55, %v442_v54  ;;  %v444_v60 = vld [vmem:[%s3866_s3 + $0xd0] sm:$0xff] }
  0x21   : > { %v3081_v59 = vpack.c.bf16 %v447_v57, %v446_v56  ;;  %v445_v61 = vld [vmem:[%s3866_s3 + $0xd8] sm:$0xff]  ;;  %v448_v62 = vld [vmem:[%s3866_s3 + $0xf0] sm:$0xff]  ;;  %v458_v16 = vld [vmem:[%s3866_s3 + $0x140] sm:$0xff]  ;;  %p3196_p12 = pnand %p3195_p11, %p3360_p5  ;;  %p3203_p2 = por %p3202_p1, %p3201_p0 }
  0x22   : > { %v449_v63 = vld [vmem:[%s3866_s3 + $0xf8] sm:$0xff]  ;;  %v3078_v1 = vpack.c.bf16 %v445_v61, %v444_v60  ;;  %v452_v9 = vld [vmem:[%s3866_s3 + $0x110] sm:$0xff]  ;;  %v459_v17 = vld [vmem:[%s3866_s3 + $0x148] sm:$0xff] }
  0x23   : > { %v453_v10 = vld [vmem:[%s3866_s3 + $0x118] sm:$0xff]  ;;  %v456_v11 = vld [vmem:[%s3866_s3 + $0x130] sm:$0xff]  ;;  %v462_v18 = vld [vmem:[%s3866_s3 + $0x160] sm:$0xff]  ;;  %p3197_p13 = pneg %p3196_p12 }
  0x24   : > { %v457_v13 = vld [vmem:[%s3866_s3 + $0x138] sm:$0xff]  ;;  %v3090_v14 = vpack.c.bf16 %v453_v10, %v452_v9  ;;  %v463_v19 = vld [vmem:[%s3866_s3 + $0x168] sm:$0xff]  ;;  %v2673_v38 = vld [vmem:[%s3853_s4 + $0x4] ss:$0 sm:$0xff] }
  0x25   : > { %v3096_v15 = vpack.c.bf16 %v457_v13, %v456_v11  ;;  %v465_v26 = vld [vmem:[%s3866_s3 + $0x178] sm:$0xff]  ;;  %v2674_v44 = vld [vmem:[%s3853_s4 + $0x5] ss:$0 sm:$0xff]  ;;  %v2675_v48 = vld [vmem:[%s3853_s4 + $0x6] ss:$0 sm:$0xff]  ;;  %p3204_p3 = pnand %p3203_p2, %p3197_p13 }
  0x26   : > { %v2676_v49 = vld [vmem:[%s3853_s4 + $0x7] ss:$0 sm:$0xff]  ;;  %v2668_v54 = vld [vmem:[%s3853_s4 + $0x3] ss:$0 sm:$0xff]  ;;  %v2681_v61 = vld [vmem:[%s3853_s4 + $0x8] ss:$0 sm:$0xff] }
  0xab   : > { %v392_v2 = vpop.xlane.xlu0 %391 }
  0xac   : > { %v394_v3 = vmul.f32 0.03125, %v392_v2  ;;  %v3084_v2 = vpack.c.bf16 %v449_v63, %v448_v62  ;;  %v2682_v62 = vld [vmem:[%s3853_s4 + $0x9] ss:$0 sm:$0xff] }
  0xae   : > { %v395_v4 = vsub.f32 %v3375_v0, %v394_v3  ;;  %v450_v3 = vld [vmem:[%s3866_s3 + $0x100] sm:$0xff] }
  0xb0   : > { %v396_v5 = vmul.f32 %v395_v4, %v395_v4 }
  0xb2   : > { %v397_v6 = vsel %vm389_vm0, %v396_v5, 0.0  ;;  %v454_v5 = vld [vmem:[%s3866_s3 + $0x120] sm:$0xff] }
  0xb3   : > { %398 = vadd.xlane.f32.xlu0 %v397_v6  ;;  %v455_v6 = vld [vmem:[%s3866_s3 + $0x128] sm:$0xff] }
  0xb4   : > { %v3093_v8 = vpack.c.bf16 %v455_v6, %v454_v5 }
 0x140   : > { %v399_v21 = vpop.xlane.xlu0 %398 }
 0x141   : > { %v400_v22 = vmul.f32 0.03125, %v399_v21  ;;  %v3099_v21 = vpack.c.bf16 %v459_v17, %v458_v16 }
 0x143   : > { %v401_v23 = vadd.f32 1e-06, %v400_v22  ;;  %v3105_v22 = vpack.c.bf16 %v463_v19, %v462_v18 }
 0x145   : > { %3170 = vrsqrt.f32 %v401_v23  ;;  %v460_v23 = vld [vmem:[%s3866_s3 + $0x150] sm:$0xff] }
 0x14f   : > { %v3171_v24 = vpop.eup %3170 }
 0x150   : > { %v403_v27 = vmul.f32 %v3171_v24, %v395_v4  ;;  %v451_v4 = vld [vmem:[%s3866_s3 + $0x108] sm:$0xff]  ;;  %v461_v24 = vld [vmem:[%s3866_s3 + $0x158] sm:$0xff] }
 0x151   : > { %v3087_v7 = vpack.c.bf16 %v451_v4, %v450_v3 }
 0x152   : > { %v410_v32 = vmul.f32 %v2663_v25, %v403_v27  ;;  %v464_v25 = vld [vmem:[%s3866_s3 + $0x170] sm:$0xff]  ;;  %v3102_v27 = vpack.c.bf16 %v461_v24, %v460_v23  ;;  %s3806_s3 = scalar_lea.hbm %s3860_s11, %s2715_s13 }
 0x153   : > { %v3108_v28 = vpack.c.bf16 %v465_v26, %v464_v25 }
 0x154   : > { %v3436_v36 = vadd.f32 %v2664_v31, %v410_v32 }
 0x156   : > { %2825 = vmatmul.mubr.msk.f32.vlgmr.msra.gmra.mrb[0].mxu0 %vm389_vm0, %v3436_v36  ;;  %2836 = vmatmul.mubr.msk.f32.vlgmr.msra.gmra.mrb[0].mxu1 %vm389_vm0, %v3436_v36 }
 0x157   : > { %3052 = vmatpush3.bf16.msra.mxu0 %v3051_v33  ;;  %3058 = vmatpush3.bf16.msra.mxu1 %v3057_v34 }
 0x158   : > { %3053 = vmatprep.subr.bf16.mxu0 %v3258_v12  ;;  %3059 = vmatprep.subr.bf16.mxu1 %v3258_v12 }
 0x159   : > { %2846 = vmatprep.mubr.msk.f32.mxu0 %vm3259_vm1, %v3260_v20  ;;  %2857 = vmatprep.mubr.msk.f32.mxu1 %vm3259_vm1, %v3260_v20 }
 0x15b   : > { %3055 = vmatpush3.bf16.msra.mxu0 %v3054_v40  ;;  %3061 = vmatpush3.bf16.msra.mxu1 %v3060_v41  ;;  %v2665_v40 = vld [vmem:[%s3853_s4] ss:$0 sm:$0xff] }
 0x15c   : > { %3062 = vmatprep.subr.bf16.mxu0 %v3258_v12  ;;  %3068 = vmatprep.subr.bf16.mxu1 %v3258_v12 }
 0x15e   : > { %2847 = vmatmul.mubr.msk.f32.vlgmr.msra.gmra.mrb[2].mxu0 %vm389_vm0, %v3436_v36  ;;  %2858 = vmatmul.mubr.msk.f32.vlgmr.msra.gmra.mrb[2].mxu1 %vm389_vm0, %v3436_v36 }
 0x15f   : > { %3064 = vmatpush3.bf16.msra.mxu0 %v3063_v46  ;;  %3070 = vmatpush3.bf16.msra.mxu1 %v3069_v47  ;;  %v2666_v46 = vld [vmem:[%s3853_s4 + $0x1] ss:$0 sm:$0xff] }
 0x160   : > { %3065 = vmatprep.subr.bf16.mxu0 %v3258_v12  ;;  %3071 = vmatprep.subr.bf16.mxu1 %v3258_v12 }
 0x161   : > { %2868 = vmatprep.mubr.msk.f32.mxu0 %vm3259_vm1, %v3260_v20  ;;  %2879 = vmatprep.mubr.msk.f32.mxu1 %vm3259_vm1, %v3260_v20 }
 0x163   : > { %3067 = vmatpush3.bf16.msra.mxu0 %v3066_v52  ;;  %3073 = vmatpush3.bf16.msra.mxu1 %v3072_v53  ;;  %v2667_v53 = vld [vmem:[%s3853_s4 + $0x2] ss:$0 sm:$0xff] }
 0x164   : > { %3074 = vmatprep.subr.bf16.mxu0 %v3258_v12  ;;  %3080 = vmatprep.subr.bf16.mxu1 %v3258_v12 }
 0x166   : > { %2869 = vmatmul.mubr.msk.f32.vlgmr.msra.gmra.mrb[4].mxu0 %vm389_vm0, %v3436_v36  ;;  %2880 = vmatmul.mubr.msk.f32.vlgmr.msra.gmra.mrb[4].mxu1 %vm389_vm0, %v3436_v36 }
 0x167   : > { %3076 = vmatpush3.bf16.msra.mxu0 %v3075_v58  ;;  %3082 = vmatpush3.bf16.msra.mxu1 %v3081_v59 }
 0x168   : > { %3077 = vmatprep.subr.bf16.mxu0 %v3258_v12  ;;  %3083 = vmatprep.subr.bf16.mxu1 %v3258_v12 }
 0x169   : > { %2890 = vmatprep.mubr.msk.f32.mxu0 %vm3259_vm1, %v3260_v20  ;;  %2901 = vmatprep.mubr.msk.f32.mxu1 %vm3259_vm1, %v3260_v20 }
 0x16b   : > { %3079 = vmatpush3.bf16.msra.mxu0 %v3078_v1  ;;  %3085 = vmatpush3.bf16.msra.mxu1 %v3084_v2 }
 0x16c   : > { %3086 = vmatprep.subr.bf16.mxu0 %v3258_v12  ;;  %3092 = vmatprep.subr.bf16.mxu1 %v3258_v12 }
 0x16e   : > { %2891 = vmatmul.mubr.msk.f32.vlgmr.msra.gmra.mrb[6].mxu0 %vm389_vm0, %v3436_v36  ;;  %2902 = vmatmul.mubr.msk.f32.vlgmr.msra.gmra.mrb[6].mxu1 %vm389_vm0, %v3436_v36 }
 0x16f   : > { %3088 = vmatpush3.bf16.msra.mxu0 %v3087_v7  ;;  %3094 = vmatpush3.bf16.msra.mxu1 %v3093_v8 }
 0x170   : > { %3089 = vmatprep.subr.bf16.mxu0 %v3258_v12  ;;  %3095 = vmatprep.subr.bf16.mxu1 %v3258_v12 }
 0x171   : > { %2912 = vmatprep.mubr.msk.f32.mxu0 %vm3259_vm1, %v3260_v20  ;;  %2923 = vmatprep.mubr.msk.f32.mxu1 %vm3259_vm1, %v3260_v20 }
 0x173   : > { %3091 = vmatpush3.bf16.msra.mxu0 %v3090_v14  ;;  %3097 = vmatpush3.bf16.msra.mxu1 %v3096_v15 }
 0x174   : > { %3098 = vmatprep.subr.bf16.mxu0 %v3258_v12  ;;  %3104 = vmatprep.subr.bf16.mxu1 %v3258_v12 }
 0x176   : > { %2913 = vmatmul.mubr.msk.f32.vlgmr.msra.gmra.mrb[8].mxu0 %vm389_vm0, %v3436_v36  ;;  %2924 = vmatmul.mubr.msk.f32.vlgmr.msra.gmra.mrb[8].mxu1 %vm389_vm0, %v3436_v36 }
 0x177   : > { %3100 = vmatpush3.bf16.msra.mxu0 %v3099_v21  ;;  %3106 = vmatpush3.bf16.msra.mxu1 %v3105_v22 }
 0x178   : > { %3101 = vmatprep.subr.bf16.mxu0 %v3258_v12  ;;  %3107 = vmatprep.subr.bf16.mxu1 %v3258_v12 }
 0x179   : > { %2934 = vmatprep.mubr.msk.f32.mxu0 %vm3259_vm1, %v3260_v20  ;;  %2945 = vmatprep.mubr.msk.f32.mxu1 %vm3259_vm1, %v3260_v20 }
 0x17b   : > { %3103 = vmatpush3.bf16.msra.mxu0 %v3102_v27  ;;  %3109 = vmatpush3.bf16.msra.mxu1 %v3108_v28 }
 0x17c   : > { %2948 = vmatprep.subr.mxu0 %v3260_v20  ;;  %2963 = vmatprep.subr.mxu1 %v3260_v20 }
 0x17e   : > { %2935 = vmatmul.mubr.msk.f32.vlgmr.msra.gmra.mrb[10].mxu0 %vm389_vm0, %v3436_v36  ;;  %2946 = vmatmul.mubr.msk.f32.vlgmr.msra.gmra.mrb[10].mxu1 %vm389_vm0, %v3436_v36 }
 0x17f   : > { %2950 = vmatprep.mubr.msk.f32.mxu0 %vm3259_vm1, %v3260_v20  ;;  %2965 = vmatprep.mubr.msk.f32.mxu1 %vm3259_vm1, %v3260_v20 }
 0x229   : > { %v571_v29 = vpop.f32.mrb[0].mxu0  ;;  %v641_v30 = vpop.f32.mrb[0].mxu1 }
 0x22a   : > { %v2826_v31 = vpop.f32.mrb[1].mxu0  ;;  %v2837_v32 = vpop.f32.mrb[1].mxu1  ;;  %v572_v45 = vadd.f32 %v2665_v40, %v571_v29  ;;  %v642_v50 = vadd.f32 %v2666_v46, %v641_v30 }
 0x231   : > { %v711_v33 = vpop.f32.mrb[2].mxu0  ;;  %v781_v34 = vpop.f32.mrb[2].mxu1 }
 0x232   : > { %v2848_v35 = vpop.f32.mrb[3].mxu0  ;;  %v2859_v37 = vpop.f32.mrb[3].mxu1  ;;  %v712_v59 = vadd.f32 %v2667_v53, %v711_v33  ;;  %v782_v60 = vadd.f32 %v2668_v54, %v781_v34 }
 0x239   : > { %v875_v39 = vpop.f32.mrb[4].mxu0  ;;  %v945_v36 = vpop.f32.mrb[4].mxu1 }
 0x23a   : > { %v876_v41 = vadd.f32 %v2673_v38, %v875_v39  ;;  %v2870_v42 = vpop.f32.mrb[5].mxu0  ;;  %v2881_v43 = vpop.f32.mrb[5].mxu1  ;;  %v946_v47 = vadd.f32 %v2674_v44, %v945_v36 }
 0x23c   : > { %2949 = vmatpush3.xpose.msk.msra.mxu0 %vm1393_vm2, %v876_v41 }
 0x23d   : > { %2953 = vmatprep.subr.mxu0 %v3260_v20 }
 0x23f   : > { %2951 = vmatmul.mubr.msk.f32.vlgmr.msra.gmra.mrb[12].mxu0 %vm1393_vm2, %v572_v45 }
 0x240   : > { %2954 = vmatpush3.xpose.msk.msra.mxu0 %vm1393_vm2, %v946_v47  ;;  %2955 = vmatprep.mubr.msk.f32.mxu0 %vm3259_vm1, %v3260_v20 }
 0x241   : > { %v1015_v51 = vpop.f32.mrb[6].mxu0  ;;  %v1085_v52 = vpop.f32.mrb[6].mxu1  ;;  %2958 = vmatprep.subr.mxu0 %v3260_v20 }
 0x242   : > { %v1016_v55 = vadd.f32 %v2675_v48, %v1015_v51  ;;  %v1086_v56 = vadd.f32 %v2676_v49, %v1085_v52  ;;  %v2892_v57 = vpop.f32.mrb[7].mxu0  ;;  %v2903_v58 = vpop.f32.mrb[7].mxu1  ;;  %v2683_v52 = vld [vmem:[%s3853_s4 + $0xa] ss:$0 sm:$0xff] }
 0x243   : > { %2956 = vmatmul.mubr.msk.f32.vlgmr.msra.gmra.mrb[14].mxu0 %vm1393_vm2, %v642_v50 }
 0x244   : > { %2959 = vmatpush3.xpose.msk.msra.mxu0 %vm1393_vm2, %v1016_v55  ;;  %2964 = vmatpush3.xpose.msk.msra.mxu1 %vm1393_vm2, %v1086_v56  ;;  %v2684_v56 = vld [vmem:[%s3853_s4 + $0xb] ss:$0 sm:$0xff] }
 0x245   : > { %2960 = vmatprep.mubr.msk.f32.mxu0 %vm3259_vm1, %v3260_v20  ;;  %2968 = vmatprep.subr.mxu0 %v3260_v20 }
 0x246   : > { %2973 = vmatprep.subr.mxu1 %v3260_v20 }
 0x247   : > { %2961 = vmatmul.mubr.msk.f32.vlgmr.msra.gmra.mrb[16].mxu0 %vm1393_vm2, %v712_v59  ;;  %2966 = vmatmul.mubr.msk.f32.vlgmr.msra.gmra.mrb[12].mxu1 %vm1393_vm2, %v782_v60 }
 0x248   : > { %2970 = vmatprep.mubr.msk.f32.mxu0 %vm3259_vm1, %v3260_v20  ;;  %2975 = vmatprep.mubr.msk.f32.mxu1 %vm3259_vm1, %v3260_v20 }
 0x249   : > { %v1179_v63 = vpop.f32.mrb[8].mxu0  ;;  %v1249_v1 = vpop.f32.mrb[8].mxu1 }
 0x24a   : > { %v1180_v2 = vadd.f32 %v2681_v61, %v1179_v63  ;;  %v1250_v3 = vadd.f32 %v2682_v62, %v1249_v1  ;;  %v2914_v4 = vpop.f32.mrb[9].mxu0  ;;  %v2925_v5 = vpop.f32.mrb[9].mxu1  ;;  %v2038_v1 = vld [vmem:[%s3854_s5] sm:$0xff] }
 0x24c   : > { %2969 = vmatpush3.msra.mxu0 %v1180_v2  ;;  %2974 = vmatpush3.msra.mxu1 %v1250_v3  ;;  %v2039_v2 = vld [vmem:[%s3854_s5 + $0x8] sm:$0xff]  ;;  %v2040_v3 = vld [vmem:[%s3854_s5 + $0x10] sm:$0xff] }
 0x24d   : > { %2978 = vmatprep.subr.mxu0 %v3260_v20  ;;  %2983 = vmatprep.subr.mxu1 %v3260_v20 }
 0x251   : > { %v3663_v6 = vpop.f32.mrb[10].mxu0  ;;  %v3665_v7 = vpop.f32.mrb[10].mxu1 }
 0x252   : > { %v2936_v8 = vpop.f32.mrb[11].mxu0  ;;  %v2947_v9 = vpop.f32.mrb[11].mxu1  ;;  %v1320_v55 = vadd.f32 %v2683_v52, %v3663_v6  ;;  %v1390_v59 = vadd.f32 %v2684_v56, %v3665_v7  ;;  %v2041_v6 = vld [vmem:[%s3854_s5 + $0x18] sm:$0xff]  ;;  %v2466_v52 = vld [vmem:[%s3858_s9] sm:$0xff] }
 0x253   : > { %v2469_v56 = vld [vmem:[%s3858_s9 + $0x18] sm:$0xff] }
 0x312   : > { %v1466_v10 = vpop.f32.mrb[12].mxu0 }
 0x313   : > { %v1698_v11 = vmul.f32 0.35355338, %v1466_v10  ;;  %v2952_v13 = vpop.f32.mrb[13].mxu0 }
 0x315   : > { %v1702_v14 = vsel %vm1393_vm2, %v1698_v11, -inf }
 0x316   : > { %1703 = vmax.xlane.f32.xlu1 %v1702_v14  ;;  %v1542_v15 = vpop.f32.mrb[14].mxu0 }
 0x317   : > { %v1699_v16 = vmul.f32 0.35355338, %v1542_v15  ;;  %v2957_v17 = vpop.f32.mrb[15].mxu0 }
 0x319   : > { %v1705_v18 = vsel %vm1393_vm2, %v1699_v16, -inf }
 0x31a   : > { %v1694_v19 = vpop.f32.mrb[12].mxu1  ;;  %1706 = vmax.xlane.f32.xlu1 %v1705_v18  ;;  %v1618_v21 = vpop.f32.mrb[16].mxu0 }
 0x31b   : > { %v1701_v22 = vmul.f32 0.35355338, %v1694_v19  ;;  %v1700_v23 = vmul.f32 0.35355338, %v1618_v21  ;;  %v2962_v24 = vpop.f32.mrb[17].mxu0  ;;  %v2967_v25 = vpop.f32.mrb[13].mxu1 }
 0x31d   : > { %v1711_v26 = vsel %vm1393_vm2, %v1701_v22, -inf  ;;  %v1708_v27 = vsel %vm1393_vm2, %v1700_v23, -inf }
 0x31e   : > { %1712 = vmax.xlane.f32.xlu1 %v1711_v26  ;;  %1709 = vmax.xlane.f32.xlu0 %v1708_v27 }
 0x3a3   : > { %v1704_v28 = vpop.xlane.xlu1 %1703 }
 0x3a4   : > { %v1714_v29 = vsub.f32 %v1698_v11, %v1704_v28 }
 0x3a6   : > { %v1718_v30 = vmul.f32 1.442695, %v1714_v29 }
 0x3a7   : > { %v1707_v31 = vpop.xlane.xlu1 %1706 }
 0x3a8   : > { %3172 = vpow2.f32 %v1718_v30  ;;  %v1715_v32 = vsub.f32 %v1699_v16, %v1707_v31 }
 0x3aa   : > { %v1720_v33 = vmul.f32 1.442695, %v1715_v32 }
 0x3ab   : > { %v1713_v34 = vpop.xlane.xlu1 %1712  ;;  %v1710_v35 = vpop.xlane.xlu0 %1709 }
 0x3ac   : > { %3174 = vpow2.f32 %v1720_v33  ;;  %v1717_v37 = vsub.f32 %v1701_v22, %v1713_v34  ;;  %v1716_v38 = vsub.f32 %v1700_v23, %v1710_v35 }
 0x3ae   : > { %v1724_v39 = vmul.f32 1.442695, %v1717_v37  ;;  %v1722_v36 = vmul.f32 1.442695, %v1716_v38 }
 0x3b0   : > { %3176 = vpow2.f32 %v1724_v39  ;;  %v2377_v39 = vld [vmem:[%s3856_s7] sm:$0xff] }
 0x3b1   : > { %3178 = vpow2.f32 %v1722_v36 }
 0x3b2   : > { %v3173_v40 = vpop.eup %3172 }
 0x3b3   : > { %v1726_v41 = vsel %vm1393_vm2, %v3173_v40, 0.0 }
 0x3b4   : > { %1727 = vadd.xlane.f32.xlu0 %v1726_v41  ;;  %v2380_v41 = vld [vmem:[%s3856_s7 + $0x18] sm:$0xff] }
 0x3b6   : > { %v3175_v42 = vpop.eup %3174 }
 0x3b7   : > { %v1729_v43 = vsel %vm1393_vm2, %v3175_v42, 0.0 }
 0x3b8   : > { %1730 = vadd.xlane.f32.xlu1 %v1729_v43 }
 0x3ba   : > { %v3177_v44 = vpop.eup %3176 }
 0x3bb   : > { %v3179_v45 = vpop.eup %3178  ;;  %v1735_v46 = vsel %vm1393_vm2, %v3177_v44, 0.0 }
 0x3bc   : > { %1736 = vadd.xlane.f32.xlu1 %v1735_v46  ;;  %v1732_v47 = vsel %vm1393_vm2, %v3179_v45, 0.0 }
 0x3bd   : > { %1733 = vadd.xlane.f32.xlu0 %v1732_v47  ;;  %v2706_v47 = vld [vmem:[%s3850_s1 + $0x1] ss:$0 sm:$0xff] }
 0x441   : > { %v1728_v48 = vpop.xlane.xlu0 %1727 }
 0x442   : > { %3180 = vrcp.f32 %v1728_v48 }
 0x445   : > { %v1731_v49 = vpop.xlane.xlu1 %1730 }
 0x446   : > { %3182 = vrcp.f32 %v1731_v49  ;;  %v2707_v49 = vld [vmem:[%s3851_s2 + $0x1] ss:$0 sm:$0xff] }
 0x449   : > { %v1737_v50 = vpop.xlane.xlu1 %1736 }
 0x44a   : > { %3184 = vrcp.f32 %v1737_v50  ;;  %v1734_v51 = vpop.xlane.xlu0 %1733 }
 0x44b   : > { %3186 = vrcp.f32 %v1734_v51 }
 0x44c   : > { %v3181_v53 = vpop.eup %3180 }
 0x44d   : > { %v1739_v54 = vmul.f32 %v3181_v53, %v3173_v40  ;;  %v2379_v40 = vld [vmem:[%s3856_s7 + $0x10] sm:$0xff]  ;;  %v2467_v53 = vld [vmem:[%s3858_s9 + $0x8] sm:$0xff] }
 0x44f   : > { %2971 = vmatmul.mubr.msk.f32.vlgmr.msra.gmra.mrb[18].mxu0 %vm1393_vm2, %v1739_v54  ;;  %v3117_v54 = vpack.c.bf16 %v2467_v53, %v2466_v52 }
 0x450   : > { %v3183_v57 = vpop.eup %3182  ;;  %2979 = vmatpush3.msra.mxu0 %v1320_v55  ;;  %2980 = vmatprep.mubr.msk.f32.mxu0 %vm3259_vm1, %v3260_v20  ;;  %v2468_v55 = vld [vmem:[%s3858_s9 + $0x10] sm:$0xff] }
 0x451   : > { %v1741_v58 = vmul.f32 %v3183_v57, %v3175_v42  ;;  %2988 = vmatprep.subr.mxu0 %v3260_v20  ;;  %v3114_v42 = vpack.c.bf16 %v2380_v41, %v2379_v40  ;;  %v3120_v57 = vpack.c.bf16 %v2469_v56, %v2468_v55 }
 0x453   : > { %2976 = vmatmul.mubr.msk.f32.vlgmr.msra.gmra.mrb[14].mxu1 %vm1393_vm2, %v1741_v58  ;;  %v2470_v58 = vld [vmem:[%s3858_s9 + $0x20] sm:$0xff] }
 0x454   : > { %v3185_v60 = vpop.eup %3184  ;;  %2984 = vmatpush3.msra.mxu1 %v1390_v59  ;;  %2985 = vmatprep.mubr.msk.f32.mxu1 %vm3259_vm1, %v3260_v20  ;;  %v2471_v59 = vld [vmem:[%s3858_s9 + $0x28] sm:$0xff] }
 0x455   : > { %v3187_v61 = vpop.eup %3186  ;;  %v1745_v62 = vmul.f32 %v3185_v60, %v3177_v44  ;;  %2993 = vmatprep.subr.mxu1 %v3260_v20  ;;  %v3123_v60 = vpack.c.bf16 %v2471_v59, %v2470_v58 }
 0x456   : > { %v1743_v63 = vmul.f32 %v3187_v61, %v3179_v45  ;;  %v2472_v61 = vld [vmem:[%s3858_s9 + $0x30] sm:$0xff] }
 0x457   : > { %2986 = vmatmul.mubr.msk.f32.vlgmr.msra.gmra.mrb[16].mxu1 %vm1393_vm2, %v1745_v62  ;;  %v2473_v62 = vld [vmem:[%s3858_s9 + $0x38] sm:$0xff] }
 0x458   : > { %2981 = vmatmul.mubr.msk.f32.vlgmr.msra.gmra.mrb[20].mxu0 %vm1393_vm2, %v1743_v63  ;;  %2995 = vmatprep.mubr.msk.f32.mxu1 %vm3259_vm1, %v3260_v20  ;;  %v3126_v63 = vpack.c.bf16 %v2473_v62, %v2472_v61 }
 0x459   : > { %2990 = vmatprep.mubr.msk.f32.mxu0 %vm3259_vm1, %v3260_v20  ;;  %2989 = vmatpush3.msra.mxu0 %v2038_v1  ;;  %v2708_v1 = vld [vmem:[%s3857_s8] ss:$0 sm:$0xff] }
 0x45a   : > { %2998 = vmatprep.subr.mxu0 %v3260_v20  ;;  %2994 = vmatpush3.msra.mxu1 %v2039_v2 }
 0x45b   : > { %3003 = vmatprep.subr.mxu1 %v3260_v20 }
 0x522   : > { %v1815_v4 = vpop.f32.mrb[18].mxu0 }
 0x523   : > { %v2972_v5 = vpop.f32.mrb[19].mxu0  ;;  %2991 = vmatmul.mubr.msk.f32.vlgmr.msra.gmra.mrb[22].mxu0 %vm1393_vm2, %v1815_v4 }
 0x524   : > { %2999 = vmatpush3.msra.mxu0 %v2040_v3  ;;  %3000 = vmatprep.mubr.msk.f32.mxu0 %vm3259_vm1, %v3260_v20 }
 0x525   : > { %3110 = vmatprep.subr.bf16.mxu0 %v3258_v12 }
 0x526   : > { %v1888_v7 = vpop.f32.mrb[14].mxu1 }
 0x527   : > { %v2977_v8 = vpop.f32.mrb[15].mxu1  ;;  %2996 = vmatmul.mubr.msk.f32.vlgmr.msra.gmra.mrb[18].mxu1 %vm1393_vm2, %v1888_v7 }
 0x528   : > { %3004 = vmatpush3.msra.mxu1 %v2041_v6  ;;  %3005 = vmatprep.mubr.msk.f32.mxu1 %vm3259_vm1, %v3260_v20 }
 0x529   : > { %3116 = vmatprep.subr.bf16.mxu1 %v3258_v12 }
 0x52a   : > { %v2034_v9 = vpop.f32.mrb[16].mxu1 }
 0x52b   : > { %v1961_v10 = vpop.f32.mrb[20].mxu0  ;;  %v2987_v11 = vpop.f32.mrb[17].mxu1  ;;  %3006 = vmatmul.mubr.msk.f32.vlgmr.msra.gmra.mrb[20].mxu1 %vm1393_vm2, %v2034_v9  ;;  %v2710_v9 = vld [vmem:[%s3859_s10] ss:$0 sm:$0xff] }
 0x52c   : > { %v2982_v13 = vpop.f32.mrb[21].mxu0  ;;  %3001 = vmatmul.mubr.msk.f32.vlgmr.msra.gmra.mrb[24].mxu0 %vm1393_vm2, %v1961_v10  ;;  %3035 = vmatprep.mubr.msk.f32.mxu1 %vm3259_vm1, %v3260_v20 }
 0x52d   : > { %3016 = vmatprep.mubr.msk.f32.mxu0 %vm3259_vm1, %v3260_v20  ;;  %v2705_v20 = vld [vmem:[%s3855_s6] ss:$0 sm:$0xff]  ;;  %3118 = vmatpush3.bf16.msra.mxu1 %v3117_v54 }
 0x52e   : > { %3119 = vmatprep.subr.bf16.mxu1 %v3258_v12 }
 0x531   : > { %3121 = vmatpush3.bf16.msra.mxu1 %v3120_v57 }
 0x532   : > { %3122 = vmatprep.subr.bf16.mxu1 %v3258_v12 }
 0x535   : > { %3124 = vmatpush3.bf16.msra.mxu1 %v3123_v60 }
 0x536   : > { %3125 = vmatprep.subr.bf16.mxu1 %v3258_v12 }
 0x539   : > { %3127 = vmatpush3.bf16.msra.mxu1 %v3126_v63 }
 0x5f6   : > { %v2111_v14 = vpop.f32.mrb[22].mxu0 }
 0x5f7   : > { %v2992_v15 = vpop.f32.mrb[23].mxu0  ;;  %v2334_v17 = vsel %vm389_vm0, %v2111_v14, 0.0 }
 0x5fa   : > { %v2184_v16 = vpop.f32.mrb[18].mxu1 }
 0x5fb   : > { %v2335_v18 = vsel %vm389_vm0, %v2184_v16, 0.0  ;;  %v2997_v19 = vpop.f32.mrb[19].mxu1 }
 0x5fc   : > { %v2336_v21 = vadd.f32 %v2335_v18, %v2334_v17 }
 0x5fe   : > { %v2330_v22 = vpop.f32.mrb[20].mxu1 }
 0x5ff   : > { %v2257_v23 = vpop.f32.mrb[24].mxu0  ;;  %v3007_v24 = vpop.f32.mrb[21].mxu1  ;;  %v2339_v28 = vsel %vm389_vm0, %v2330_v22, 0.0 }
 0x600   : > { %v2337_v25 = vsel %vm389_vm0, %v2257_v23, 0.0  ;;  %v3002_v26 = vpop.f32.mrb[25].mxu0 }
 0x601   : > { %v2338_v27 = vadd.f32 %v2337_v25, %v2336_v21  ;;  %v2712_v26 = vld [vmem:[%s3850_s1 + $0x2] ss:$0 sm:$0xff] }
 0x603   : > { %v2340_v29 = vadd.f32 %v2339_v28, %v2338_v27  ;;  %v2713_v28 = vld [vmem:[%s3851_s2 + $0x2] ss:$0 sm:$0xff] }
 0x605   : > { %v2348_v30 = vadd.f32 %v2705_v20, %v2340_v29 }
 0x607   : > { %v3733_v31 = vadd.f32 %v2348_v30, %v3375_v0  ;;  %v2378_v0 = vld [vmem:[%s3856_s7 + $0x8] sm:$0xff] }
 0x608   : > { %v3111_v36 = vpack.c.bf16 %v2378_v0, %v2377_v39 }
 0x609   : > { %v2350_v32 = vsel %vm389_vm0, %v3733_v31, 0.0 }
 0x60a   : > { %2351 = vadd.xlane.f32.xlu0 %v2350_v32  ;;  %3112 = vmatpush3.bf16.msra.mxu0 %v3111_v36 }
 0x60b   : > { %3113 = vmatprep.subr.bf16.mxu0 %v3258_v12 }
 0x60e   : > { %3115 = vmatpush3.bf16.msra.mxu0 %v3114_v42 }
 0x697   : > { %v2352_v33 = vpop.xlane.xlu0 %2351 }
 0x698   : > { %v2353_v34 = vmul.f32 0.03125, %v2352_v33 }
 0x69a   : > { %v2354_v35 = vsub.f32 %v3733_v31, %v2353_v34 }
 0x69c   : > { %v2355_v37 = vmul.f32 %v2354_v35, %v2354_v35 }
 0x69e   : > { %v2356_v38 = vsel %vm389_vm0, %v2355_v37, 0.0 }
 0x69f   : > { %2357 = vadd.xlane.f32.xlu1 %v2356_v38 }
 0x72c   : > { %v2358_v43 = vpop.xlane.xlu1 %2357 }
 0x72d   : > { %v2359_v44 = vmul.f32 0.03125, %v2358_v43 }
 0x72f   : > { %v2360_v45 = vadd.f32 1e-06, %v2359_v44 }
 0x731   : > { %3188 = vrsqrt.f32 %v2360_v45 }
 0x73b   : > { %v3189_v46 = vpop.eup %3188 }
 0x73c   : > { %v2362_v48 = vmul.f32 %v3189_v46, %v2354_v35 }
 0x73e   : > { %v2369_v50 = vmul.f32 %v2706_v47, %v2362_v48 }
 0x740   : > { %v2376_v51 = vadd.f32 %v2707_v49, %v2369_v50 }
 0x742   : > { %3017 = vmatmul.mubr.msk.f32.vlgmr.msra.gmra.mrb[26].mxu0 %vm389_vm0, %v2376_v51 }
 0x815   : > { %v2457_v2 = vpop.f32.mrb[26].mxu0 }
 0x816   : > { %v2458_v3 = vadd.f32 %v2708_v1, %v2457_v2  ;;  %v3018_v4 = vpop.f32.mrb[27].mxu0 }
 0x818   : > { %v2462_v5 = vmul.f32 0.70710677, %v2458_v3  ;;  %v2461_v6 = vmul.f32 0.5, %v2458_v3 }
 0x81a   : > { %3190 = verf.f32 %v2462_v5 }
 0x824   : > { %v3191_v12 = vpop.eup %3190 }
 0x825   : > { %v2464_v7 = vadd.f32 1.0, %v3191_v12 }
 0x827   : > { %v2465_v8 = vmul.f32 %v2464_v7, %v2461_v6 }
 0x829   : > { %3036 = vmatmul.mubr.msk.f32.vlgmr.msra.gmra.mrb[22].mxu1 %vm2481_vm3, %v2465_v8 }
 0x8fc   : > { %v2551_v10 = vpop.f32.mrb[22].mxu1 }
 0x8fd   : > { %v2552_v11 = vadd.f32 %v2710_v9, %v2551_v10  ;;  %v3037_v13 = vpop.f32.mrb[23].mxu1 }
 0x8ff   : > { %v2555_v14 = vadd.f32 %v2552_v11, %v3733_v31 }
 0x901   : > { %v2556_v15 = vsel %vm389_vm0, %v2555_v14, 0.0 }
 0x902   : > { %2557 = vadd.xlane.f32.xlu0 %v2556_v15 }
 0x98f   : > { %v2558_v16 = vpop.xlane.xlu0 %2557 }
 0x990   : > { %v2559_v17 = vmul.f32 0.03125, %v2558_v16 }
 0x992   : > { %v2560_v18 = vsub.f32 %v2555_v14, %v2559_v17 }
 0x994   : > { %v2561_v19 = vmul.f32 %v2560_v18, %v2560_v18 }
 0x996   : > { %v2562_v21 = vsel %vm389_vm0, %v2561_v19, 0.0 }
 0x997   : > { %2563 = vadd.xlane.f32.xlu1 %v2562_v21 }
 0xa24   : > { %v2564_v22 = vpop.xlane.xlu1 %2563 }
 0xa25   : > { %v2565_v23 = vmul.f32 0.03125, %v2564_v22 }
 0xa27   : > { %v2566_v24 = vadd.f32 1e-06, %v2565_v23 }
 0xa29   : > { %3192 = vrsqrt.f32 %v2566_v24 }
 0xa33   : > { %v3193_v25 = vpop.eup %3192 }
 0xa34   : > { %v2568_v27 = vmul.f32 %v3193_v25, %v2560_v18 }
 0xa36   : > { %v2575_v20 = vmul.f32 %v2712_v26, %v2568_v27 }
 0xa38   : > { %v2582_v29 = vadd.f32 %v2713_v28, %v2575_v20 }
 0xa3a   : > { %2583 = vst.msk [vmem:[%s377_s14] sm:$0xff] %vm389_vm0, %v2582_v29 }
 0xa3b   : > { %3207 = shalt.err (!%p3204_p3)
}
 0xa3c   : > { %s3208_s24 = scalar_lea.hbm %s3806_s3, 128  ;;  %s3212_s14 = scalar_lea.hbm %s3860_s11, 256 }
 0xa3d   : > { %p3209_p4 = scmp.ne.s32.totalorder %s3806_s3, %s3208_s24  ;;  %p3213_p9 = scmp.lt.u32.totalorder %s3806_s3, %s3860_s11 }
 0xa3e   : > { %p3214_p10 = scmp.lt.u32.totalorder %s3212_s14, %s3208_s24  ;;  %p3216_p12 = scmp.lt.u32.totalorder %s3208_s24, %s3806_s3 }
 0xa3f   : > { %p3210_p7 = pnand %p3209_p4, %p3360_p5 }
 0xa40   : > { %p3215_p11 = por %p3214_p10, %p3213_p9 }
 0xa41   : > { %p3211_p8 = pneg %p3210_p7 }
 0xa42   : > { %p3217_p13 = por %p3216_p12, %p3215_p11 }
 0xa44   : > { %p3218_p0 = pnand %p3217_p13, %p3211_p8 }
 0xa46   : > { %3221 = shalt.err (!%p3218_p0)
}
 0xa47   : > { %3128 = dma.vmem_to_hbm [thread:$0]  (%p3360_p5), %s3808_s15, 128, %s3806_s3, %s2585_s25  }
 0xa48 PF: > { %p3134_p1 = scmp.ge.s32.totalorder %s3256_s20, 2  ;;  %s2610_s29 = sand.u32 1, %s3244_s17  }
 0xa49   : > { %s2611_s21 = scalar_lea.sflag [#allocation3], %s2610_s29 }
 0xa4a   : > { %p3131_p2 = pnand %p3134_p1, %p3364_p6 }
 0xa4c   : > { %3239 = dma.done.wait (!%p3131_p2), %s2611_s21, 128  }
 0xa4d   : > { %3241 = vsyncadd (!%p3131_p2), %s2611_s21, 4294967168  ;;  %p21_p3 = scmp.ge.s32.totalorder %s3347_s23, 4   ;;  %s3867_s17 = smov %s3248_s18 }
 0xa4e   : > { %s3868_s18 = smov %s3252_s19  ;;  %s3869_s19 = smov %s3358_s26 }
 0xa4f   : > { %s3870_s20 = smov %s3347_s23  ;;  %23 = sbr.rel (!%p21_p3) target bundleno = 6 (0x6), region = 99 }
 0xa56   :  { %2616 = vsyncpa [#allocation3], 1 }
 0xa57   :  { %2618 = vsyncpa [#allocation3 + $0x1], 1 }

</bundles_post_ra>
